<compile_context>
chip_gen: v7x
topology: tpu7x:2x2x1
jax: 0.10.0
libtpu: 0.0.40
codegen_flags: <defaults>
</compile_context>

<pallas_src>
import numpy as np
import jax
import jax.numpy as jnp
from jax.experimental import pallas as pl
from jax.experimental.pallas import tpu as pltpu


# ----------------------------- helpers ------------------------------------

def _round_up(n, m):
    return ((n + m - 1) // m) * m


def _vmem_limit(block_bytes):
    # Explicit scoped-VMEM cap sized from the live tiles (double-buffered),
    # above v5e's 16 MiB scoped default and below v7x's 64 MiB physical VMEM.
    need = 2 * block_bytes + (4 << 20)
    return int(min(max(need, 32 << 20), 48 << 20))


# ----------------------------- Pallas kernels -----------------------------

def _cplx_mode_matmul_kernel(x_ref, w_ref, o_ref):
    # x_ref: [tile_n, 2I]   bf16, real||imag of one row tile of one mode
    # w_ref: [M, 2I, 2O]    bf16, fully resident packed complex weights
    # o_ref: [tile_n, 2O]   f32, real||imag
    m = pl.program_id(0)
    o_ref[...] = jnp.dot(x_ref[...], w_ref[m],
                         preferred_element_type=jnp.float32)


def cplx_mode_matmul(xp, wp, tile_n=512):
    """Per-mode complex matmul in packed-real form.

    xp : [M, N, 2I]   real||imag of the truncated Fourier coefficients
    wp : [M, 2I, 2O]  packed as [[wr, wi], [-wi, wr]]
    returns [M, N, 2O] float32  (real||imag along the last axis)
    """
    M, N, I2 = xp.shape
    O2 = wp.shape[-1]
    tile_n = min(tile_n, _round_up(N, 8))
    pad = (-N) % tile_n
    if pad:
        xp = jnp.pad(xp, ((0, 0), (0, pad), (0, 0)))
    Np = N + pad
    xp = xp.astype(jnp.bfloat16)
    wp = wp.astype(jnp.bfloat16)

    block_bytes = (tile_n * I2 * 2          # x tile (bf16)
                   + M * I2 * O2 * 2        # resident packed weights (bf16)
                   + tile_n * O2 * 4)       # out tile (f32)

    out = pl.pallas_call(
        _cplx_mode_matmul_kernel,
        out_shape=jax.ShapeDtypeStruct((M, Np, O2), jnp.float32),
        grid=(M, Np // tile_n),
        in_specs=[
            pl.BlockSpec((None, tile_n, I2), lambda m, r: (m, r, 0)),
            # whole weight tensor, constant index -> DMA'd once, stays in VMEM
            pl.BlockSpec((M, I2, O2), lambda m, r: (0, 0, 0)),
        ],
        out_specs=pl.BlockSpec((None, tile_n, O2), lambda m, r: (m, r, 0)),
        compiler_params=pltpu.CompilerParams(
            dimension_semantics=("parallel", "parallel"),
            vmem_limit_bytes=_vmem_limit(block_bytes)),
    )(xp, wp)
    return out[:, :N, :] if pad else out


def _ffn_kernel(x_ref, w1_ref, b1_ref, w2_ref, b2_ref, o_ref):
    h = jnp.dot(x_ref[...], w1_ref[...],
                preferred_element_type=jnp.float32) + b1_ref[...]
    h = jnp.maximum(h, 0.0)
    o_ref[...] = jnp.dot(h.astype(w2_ref.dtype), w2_ref[...],
                         preferred_element_type=jnp.float32) + b2_ref[...]


def feedforward(x2d, w1, b1, w2, b2, tile_n=1024):
    """Fused 2-layer MLP: relu(x @ w1 + b1) @ w2 + b2.

    Row-tiled (default 1024 rows), remainder handled by padding, bf16 matmul
    operands with f32 accumulation. Used both for a single FFN and for the
    fused backcast||forecast FFN (block-diagonal w2)."""
    N, C = x2d.shape
    H = w1.shape[1]
    O = w2.shape[1]
    tile_n = min(tile_n, _round_up(N, 8))
    pad = (-N) % tile_n
    if pad:
        x2d = jnp.pad(x2d, ((0, pad), (0, 0)))
    Np = N + pad
    x2d = x2d.astype(jnp.bfloat16)
    w1 = w1.astype(jnp.bfloat16)
    w2 = w2.astype(jnp.bfloat16)

    block_bytes = (tile_n * C * 2 + C * H * 2 + H * 4
                   + H * O * 2 + O * 4 + tile_n * O * 4)

    out = pl.pallas_call(
        _ffn_kernel,
        out_shape=jax.ShapeDtypeStruct((Np, O), jnp.float32),
        grid=(Np // tile_n,),
        in_specs=[
            pl.BlockSpec((tile_n, C), lambda r: (r, 0)),
            pl.BlockSpec((C, H), lambda r: (0, 0)),
            pl.BlockSpec((1, H), lambda r: (0, 0)),
            pl.BlockSpec((H, O), lambda r: (0, 0)),
            pl.BlockSpec((1, O), lambda r: (0, 0)),
        ],
        out_specs=pl.BlockSpec((tile_n, O), lambda r: (r, 0)),
        compiler_params=pltpu.CompilerParams(
            dimension_semantics=("parallel",),
            vmem_limit_bytes=_vmem_limit(block_bytes)),
    )(x2d, w1, b1, w2, b2)
    return out[:N] if pad else out


# ----------------------------- model forward ------------------------------

def _pack_cplx_weight(wr, wi):
    # [xr | xi] @ [[wr, wi], [-wi, wr]] = [xr@wr - xi@wi | xr@wi + xi@wr]
    top = jnp.concatenate([wr, wi], axis=-1)       # [M, I, 2O]
    bot = jnp.concatenate([-wi, wr], axis=-1)      # [M, I, 2O]
    return jnp.concatenate([top, bot], axis=1)     # [M, 2I, 2O]


def _spectral_branch(x, axis, modes, w_packed, out_dim):
    """One factorized Fourier branch along spatial `axis` of channels-last x."""
    # TODO(synk): rfft/irfft have no Pallas equivalent; they stay in plain JAX.
    n = x.shape[axis]
    xf = jnp.fft.rfft(x, axis=axis, norm='ortho')            # complex64
    xf = jax.lax.slice_in_dim(xf, 0, modes, axis=axis)       # keep low modes
    # Pack real/imag along the channel axis (bf16) before the layout shuffle so
    # the transpose+reshape is a single half-width pass over one real tensor.
    xp = jnp.concatenate([jnp.real(xf), jnp.imag(xf)],
                         axis=-1).astype(jnp.bfloat16)       # [..., 2I]
    perm = (axis,) + tuple(a for a in range(4) if a != axis) + (4,)
    xp = jnp.transpose(xp, perm)                             # [M, r0, r1, r2, 2I]
    rest = xp.shape[1:4]
    nrows = int(np.prod(rest))
    xp2 = xp.reshape(modes, nrows, xp.shape[-1])
    out = cplx_mode_matmul(xp2, w_packed)                    # [M, nrows, 2O] f32
    of = (out[..., :out_dim] + 1j * out[..., out_dim:]).astype(jnp.complex64)
    of = of.reshape((modes,) + rest + (out_dim,))
    inv = tuple(int(i) for i in np.argsort(perm))
    of = jnp.transpose(of, inv)                              # modes back to `axis`
    pad = [(0, 0)] * 5
    pad[axis] = (0, n // 2 + 1 - modes)
    of = jnp.pad(of, pad)                                    # zero out high modes
    return jnp.fft.irfft(of, n=n, axis=axis, norm='ortho')


def spectral_conv3d_forward(x, p):
    """Returns (backcast, forecast) like SpectralConv3d.forward."""
    O = p['out_dim']
    wx = _pack_cplx_weight(p['wx_r'], p['wx_i'])
    wy = _pack_cplx_weight(p['wy_r'], p['wy_i'])
    wz = _pack_cplx_weight(p['wz_r'], p['wz_i'])
    xx = _spectral_branch(x, 1, p['modes_x'], wx, O)
    xy = _spectral_branch(x, 2, p['modes_y'], wy, O)
    xz = _spectral_branch(x, 3, p['modes_z'], wz, O)
    xf = xx + xy + xz                                        # [B,S1,S2,S3,O]
    B, S1, S2, S3, _ = xf.shape
    x2 = xf.reshape(B * S1 * S2 * S3, O)

    if p['use_fork']:
        # Fuse backcast + forecast FFNs into one pallas_call: the big
        # activation tensor is read from HBM once; w2 is block-diagonal so the
        # output is a single lane-dense [tile, 2*O] store per row tile.
        w1 = jnp.concatenate([p['bc_w1'], p['fc_w1']], axis=1)      # [C, 2H]
        b1 = jnp.concatenate([p['bc_b1'], p['fc_b1']], axis=1)      # [1, 2H]
        z = jnp.zeros_like(p['bc_w2'])
        w2 = jnp.concatenate(
            [jnp.concatenate([p['bc_w2'], z], axis=1),
             jnp.concatenate([z, p['fc_w2']], axis=1)], axis=0)     # [2H, 2O]
        b2 = jnp.concatenate([p['bc_b2'], p['fc_b2']], axis=1)      # [1, 2O]
        out = feedforward(x2, w1, b1, w2, b2)                       # [N, 2O]
        b = out[:, :O].reshape(B, S1, S2, S3, O)
        f = out[:, O:].reshape(B, S1, S2, S3, O)
        return b, f

    out = feedforward(x2, p['bc_w1'], p['bc_b1'], p['bc_w2'], p['bc_b2'])
    return out.reshape(B, S1, S2, S3, -1), None


# --------------------------- reference (pure JAX) --------------------------

def _reference_forward(x, p):
    xcf = jnp.transpose(x, (0, 4, 1, 2, 3))  # b i x y z (torch layout)
    B, I, S1, S2, S3 = xcf.shape
    O = p['out_dim']

    def w_cplx(wr, wi):  # [M,I,O] -> [I,O,M] complex like view_as_complex
        return jnp.transpose(wr + 1j * wi, (1, 2, 0))

    mz, my, mx = p['modes_z'], p['modes_y'], p['modes_x']
    x_ftz = jnp.fft.rfft(xcf, axis=-1, norm='ortho')
    oz = jnp.zeros((B, O, S1, S2, S3 // 2 + 1), jnp.complex64)
    oz = oz.at[..., :mz].set(jnp.einsum('bixyz,ioz->boxyz',
                                        x_ftz[..., :mz],
                                        w_cplx(p['wz_r'], p['wz_i'])))
    xz = jnp.fft.irfft(oz, n=S3, axis=-1, norm='ortho')

    x_fty = jnp.fft.rfft(xcf, axis=-2, norm='ortho')
    oy = jnp.zeros((B, O, S1, S2 // 2 + 1, S3), jnp.complex64)
    oy = oy.at[:, :, :, :my, :].set(jnp.einsum('bixyz,ioy->boxyz',
                                               x_fty[:, :, :, :my, :],
                                               w_cplx(p['wy_r'], p['wy_i'])))
    xy = jnp.fft.irfft(oy, n=S2, axis=-2, norm='ortho')

    x_ftx = jnp.fft.rfft(xcf, axis=-3, norm='ortho')
    ox = jnp.zeros((B, O, S1 // 2 + 1, S2, S3), jnp.complex64)
    ox = ox.at[:, :, :mx, :, :].set(jnp.einsum('bixyz,iox->boxyz',
                                               x_ftx[:, :, :mx, :, :],
                                               w_cplx(p['wx_r'], p['wx_i'])))
    xxb = jnp.fft.irfft(ox, n=S1, axis=-3, norm='ortho')

    xf = jnp.transpose(xxb + xy + xz, (0, 2, 3, 4, 1))

    def ffn(z, w1, b1, w2, b2):
        h = jnp.maximum(z @ w1 + b1[0], 0.0)
        return h @ w2 + b2[0]

    flat = xf.reshape(-1, O)
    b = ffn(flat, p['bc_w1'], p['bc_b1'], p['bc_w2'], p['bc_b2'])
    f = ffn(flat, p['fc_w1'], p['fc_b1'], p['fc_w2'], p['fc_b2']) if p['use_fork'] else None
    b = b.reshape(xf.shape[:-1] + (-1,))
    f = None if f is None else f.reshape(xf.shape[:-1] + (-1,))
    return b, f


# ------------------------------- init -------------------------------------

def init_params(key, in_dim, out_dim, modes_x, modes_y, modes_z,
                factor, use_fork):
    ks = jax.random.split(key, 7)

    def xavier_fourier(k, n_modes):
        # torch xavier_normal_ on a [I, O, modes, 2] tensor
        fan_in = out_dim * n_modes * 2
        fan_out = in_dim * n_modes * 2
        std = (2.0 / (fan_in + fan_out)) ** 0.5
        w = std * jax.random.normal(k, (in_dim, out_dim, n_modes, 2),
                                    dtype=jnp.float32)
        # store as [modes, in, out] real / imag
        return (jnp.transpose(w[..., 0], (2, 0, 1)),
                jnp.transpose(w[..., 1], (2, 0, 1)))

    wx_r, wx_i = xavier_fourier(ks[0], modes_x)
    wy_r, wy_i = xavier_fourier(ks[1], modes_y)
    wz_r, wz_i = xavier_fourier(ks[2], modes_z)

    hid = out_dim * factor

    def linear(k, din, dout):
        # weight_norm is a reparameterization with an identical forward pass:
        # we initialize the effective weight directly (stored [in, out]).
        kw, kb = jax.random.split(k)
        bound = 1.0 / np.sqrt(din)
        w = jax.random.uniform(kw, (din, dout), jnp.float32, -bound, bound)
        b = jax.random.uniform(kb, (1, dout), jnp.float32, -bound, bound)
        return w, b

    bc_w1, bc_b1 = linear(ks[3], out_dim, hid)
    bc_w2, bc_b2 = linear(ks[4], hid, out_dim)
    fc_w1, fc_b1 = linear(ks[5], out_dim, hid)
    fc_w2, fc_b2 = linear(ks[6], hid, out_dim)

    return dict(
        in_dim=in_dim, out_dim=out_dim,
        modes_x=modes_x, modes_y=modes_y, modes_z=modes_z,
        use_fork=use_fork,
        wx_r=wx_r, wx_i=wx_i, wy_r=wy_r, wy_i=wy_i, wz_r=wz_r, wz_i=wz_i,
        bc_w1=bc_w1, bc_b1=bc_b1, bc_w2=bc_w2, bc_b2=bc_b2,
        fc_w1=fc_w1, fc_b1=fc_b1, fc_w2=fc_w2, fc_b2=fc_b2,
    )


# ------------------------------- main --------------------------------------

if __name__ == "__main__":
    B, S1, S2, S3 = 2, 16, 16, 16
    in_dim = out_dim = 16
    modes = 8
    factor = 4
    use_fork = True

    key = jax.random.PRNGKey(0)
    kx, kp = jax.random.split(key)
    x = jax.random.normal(kx, (B, S1, S2, S3, in_dim), dtype=jnp.float32)
    params = init_params(kp, in_dim, out_dim, modes, modes, modes,
                         factor, use_fork)

    b, f = spectral_conv3d_forward(x, params)
    jax.block_until_ready(b)
    jax.block_until_ready(f)

    # correctness check against a pure-JAX f32 reference of the torch
    # semantics (tolerance relaxed for the bf16 matmul operands)
    b_ref, f_ref = _reference_forward(x, params)
    assert np.allclose(np.asarray(b), np.asarray(b_ref), atol=2e-2, rtol=2e-2)
    assert np.allclose(np.asarray(f), np.asarray(f_ref), atol=2e-2, rtol=2e-2)

    print("KERNEL_OK")
</pallas_src>

<mosaic_0001>
module attributes {stable_mosaic.version = 11 : i64} {
  func.func @_cplx_mode_matmul_kernel(%arg0: i32, %arg1: i32, %arg2: memref<1x512x32xbf16, #tpu.memory_space<vmem>>, %arg3: memref<8x32x32xbf16, #tpu.memory_space<vmem>>, %arg4: memref<1x512x32xf32, #tpu.memory_space<vmem>>) attributes {dimension_semantics = [#tpu.dimension_semantics<parallel>, #tpu.dimension_semantics<parallel>], iteration_bounds = array<i64: 8, 1>, scalar_prefetch = 0 : i64, scratch_operands = 0 : i64, tpu.core_type = #tpu.core_type<tc>, window_params = [{transform_indices = @transform_0, window_bounds = array<i64: 1, 512, 32>}, {pipeline_mode = #tpu.pipeline_mode<synchronous>, transform_indices = @transform_1, window_bounds = array<i64: 8, 32, 32>}, {transform_indices = @transform_2, window_bounds = array<i64: 1, 512, 32>}]} {
    %c0 = arith.constant 0 : index
    %c0_0 = arith.constant 0 : index
    %c0_1 = arith.constant 0 : index
    %0 = vector.load %arg2[%c0, %c0_0, %c0_1] : memref<1x512x32xbf16, #tpu.memory_space<vmem>>, vector<1x512x32xbf16>
    %1 = vector.shape_cast %0 : vector<1x512x32xbf16> to vector<512x32xbf16>
    %2 = arith.index_cast %arg0 : i32 to index
    %c0_2 = arith.constant 0 : index
    %c0_3 = arith.constant 0 : index
    %3 = vector.load %arg3[%2, %c0_2, %c0_3] : memref<8x32x32xbf16, #tpu.memory_space<vmem>>, vector<1x32x32xbf16>
    %4 = vector.shape_cast %3 : vector<1x32x32xbf16> to vector<32x32xbf16>
    %cst = arith.constant dense<0.000000e+00> : vector<512x32xf32>
    %5 = tpu.matmul %1, %4, %cst {dimension_numbers = #tpu.dot_dimension_numbers<[1], [0], [0], [1], [0, 0, 1, 1], [], []>} : vector<512x32xbf16>, vector<32x32xbf16>, vector<512x32xf32> -> vector<512x32xf32>
    %c0_4 = arith.constant 0 : index
    %c0_5 = arith.constant 0 : index
    %c0_6 = arith.constant 0 : index
    %6 = vector.load %arg4[%c0_4, %c0_5, %c0_6] : memref<1x512x32xf32, #tpu.memory_space<vmem>>, vector<1x512x32xf32>
    %7 = vector.shape_cast %6 : vector<1x512x32xf32> to vector<512x32xf32>
    %8 = vector.shape_cast %5 : vector<512x32xf32> to vector<1x512x32xf32>
    tpu.vector_store %arg4[%c0_4, %c0_5, %c0_6], %8 {strides = array<i32>} : memref<1x512x32xf32, #tpu.memory_space<vmem>>, vector<1x512x32xf32>,
    return
  }
  func.func @transform_0(%arg0: i32, %arg1: i32) -> (i32, i32, i32) {
    %c0_i32 = arith.constant 0 : i32
    %c0_i32_0 = arith.constant 0 : i32
    return %arg0, %arg1, %c0_i32 : i32, i32, i32
  }
  func.func @transform_1(%arg0: i32, %arg1: i32) -> (i32, i32, i32) {
    %c0_i32 = arith.constant 0 : i32
    %c0_i32_0 = arith.constant 0 : i32
    %c0_i32_1 = arith.constant 0 : i32
    %c0_i32_2 = arith.constant 0 : i32
    return %c0_i32, %c0_i32_0, %c0_i32_1 : i32, i32, i32
  }
  func.func @transform_2(%arg0: i32, %arg1: i32) -> (i32, i32, i32) {
    %c0_i32 = arith.constant 0 : i32
    %c0_i32_0 = arith.constant 0 : i32
    return %arg0, %arg1, %c0_i32 : i32, i32, i32
  }
}

</mosaic_0001>

<bundles_post_ra>
// kernel: tpu_custom_call.1
= control target key start
LH: loop header
LB: loop body
LE: loop exit
PB: predicated region body
PF: predicated region fallthrough
CT: control target
= control target key end

     0   :  { %7 = vsyncpa [#allocation3], 0  ;;  %s1328_s9 = smov 0   ;;  %s1330_s10 = smov 0   ;;  %s1605_s0 = inlined_call_operand.vmem [shape: bf16[8,512,32], index: 0, kind: input, shape index: {}]   ;;  %s1606_s1 = inlined_call_operand.hbm [shape: bf16[8,32,32], index: 1, kind: input, shape index: {}]   ;;  %s1607_s2 = inlined_call_operand.vmem [shape: f32[8,512,32], index: 2, kind: output, shape index: {}]  }
   0x1   :  { %s1332_s11 = smov 0  }
   0x2 LB: > { %s993_s12 = sadd.s32 4294967295, %s1308_s11   ;;  %s25_s13 = sadd.s32 1, %s1304_s10  ;;  %s1308_s11 = sphi %s1332_s11, %s13_s11   ;;  %s1304_s10 = sphi %s1330_s10, %s1617_s10   ;;  %s1300_s9 = sphi %s1328_s9, %s1616_s9  }
   0x3   : > { %p27_p0 = scmp.ge.s32.totalorder %s25_s13, 8  ;;  %p995_p1 = scmp.ge.s32.totalorder %s1308_s11, 1 }
   0x4   : > { %p107_p2 = scmp.lt.s32.totalorder %s1308_s11, 9  ;;  %p1353_p4 = scmp.eq.s32.totalorder %s993_s12, 0 }
   0x5   : > { %s1619_s13 = smov (%p27_p0, %s25_s13), 0  ;;  %s1310_s16 = smov [#allocation2]  }
   0x6   : > { %p1349_p3 = pnand %p995_p1, %p107_p2  ;;  %s119_s17 = sshll.u32 %s1310_s16, 4  ;;  %s120_s17 = int_to_ptr.vmem [resolvable:$true] %s119_s17 }
   0x7   : > { %s1612_s15 = scalar_select %p1353_p4, 1, 0 }
   0x8   : > { %s1611_s14 = scalar_select %p1349_p3, 1, 0 }
   0x9   : > { %p1187_p5 = pneg %p1349_p3  ;;  %s1254_s21 = scalar_lea.hbm %s1606_s1, 2048 }
   0xa   : > { %p1255_p7 = scmp.ne.s32.totalorder %s1606_s1, %s1254_s21  ;;  %p1261_p11 = scmp.lt.u32.totalorder %s1254_s21, %s1606_s1 }
   0xb   : > { %p1361_p6 = pnand %p1353_p4, %p1187_p5 }
   0xd   : > { %p1256_p8 = pneg %p1361_p6 }
   0xf   : > { %p1257_p9 = pnand %p1256_p8, %p1255_p7 }
  0x11   : > { %p1258_p10 = pneg %p1257_p9 }
  0x13   : > { %p1263_p12 = pnand %p1261_p11, %p1258_p10 }
  0x15   : > { %1266 = shalt.err (!%p1263_p12)
}
  0x16   : > { %s1267_s26 = scalar_lea.vmem %s120_s17, 2048  ;;  %p1275_p2 = scmp.lt.s32.totalorder %s120_s17, %s120_s17 }
  0x17   : > { %p1268_p13 = scmp.ne.s32.totalorder %s120_s17, %s1267_s26  ;;  %p1276_p5 = scmp.lt.s32.totalorder %s1267_s26, %s1267_s26 }
  0x19   : > { %p1270_p0 = pnand %p1268_p13, %p1256_p8  ;;  %p1277_p4 = por %p1276_p5, %p1275_p2 }
  0x1b   : > { %p1271_p1 = pneg %p1270_p0 }
  0x1d   : > { %p1278_p3 = pnand %p1277_p4, %p1271_p1 }
  0x1f   : > { %1281 = shalt.err (!%p1278_p3)
}
  0x20   : > { %s1311_s27 = smov 64   ;;  %s1312_s28 = smov 4  }
  0x21   : > { %1190 = dma.hbm_to_vmem [thread:$0]  (!%p1361_p6), %s1606_s1, 2048, %s120_s17, [#allocation3], %s1311_s27, %s1311_s27, %s1312_s28  }
  0x22   : > { %p1614_p7 = scmp.ne.s32.totalorder %s1611_s14, 0 }
  0x23   : > { %p1615_p9 = scmp.ne.s32.totalorder (!%p1614_p7), %s1612_s15, 0 }
  0x24   : > { %148 = sbr.rel (%p1614_p7) target bundleno = 327 (0x147), region = 28 }
  0x2b   : > { %1295 = dma.done.wait (%p1615_p9), [#allocation3], 2048  }
  0x2c   : > { %1297 = vsyncadd (%p1615_p9), [#allocation3], 4294965248  ;;  %p179_p3 = scmp.lt.s32.totalorder %s1300_s9, 7  ;;  %s1076_s3 = sshll.u32 %s1300_s9, 4  ;;  %vm442_vm0 = vcmask 261120  }
  0x2d   : > { %s265_s8 = scalar_lea.vmem [#allocation2], %s1076_s3 }
  0x2e   : > { %s1621_s9 = smov (!%p179_p3, %s1300_s9), 7  ;;  %v1220_v0 = vld [vmem:[%s265_s8] sm:$0xff]   ;;  %v1221_v1 = vld [vmem:[%s265_s8 + $0x8] sm:$0xff]  }
  0x2f   : > { %s1074_s4 = sshll.u32 %s1621_s9, 8  ;;  %1111 = vmatprep.subr.bf16.mxu0 %v1220_v0  ;;  %1179 = vmatprep.subr.bf16.mxu1 %v1220_v0  ;;  %s1075_s12 = sshll.u32 %s1621_s9, 9 }
  0x30   : > { %s1396_s7 = scalar_lea.vmem %s1605_s0, %s1074_s4  ;;  %1112 = vmatpush3.bf16.msra.mxu0 %v1220_v0  ;;  %1181 = vmatpush3.bf16.msra.mxu1 %v1220_v0  ;;  %s1466_s16 = scalar_lea.vmem %s1607_s2, %s1075_s12 }
  0x31   : > { %v1222_v2 = vld [vmem:[%s1396_s7] sm:$0xff]   ;;  %1113 = vmatprep.subr.bf16.mxu0 %v1221_v1  ;;  %1180 = vmatprep.subr.bf16.mxu1 %v1221_v1  ;;  %v1224_v4 = vld [vmem:[%s1396_s7 + $0x8] sm:$0xff]   ;;  %v1226_v6 = vld [vmem:[%s1396_s7 + $0x10] sm:$0xff]  }
  0x32   : > { %v1223_v3 = vld [vmem:[%s1396_s7 + $0x80] sm:$0xff]   ;;  %1115 = vmatprep.mubr.msk.bf16.mxu0 %vm442_vm0, %v1222_v2  ;;  %v1225_v5 = vld [vmem:[%s1396_s7 + $0x88] sm:$0xff]   ;;  %v1227_v7 = vld [vmem:[%s1396_s7 + $0x90] sm:$0xff]  }
  0x33   : > { %1147 = vmatprep.mubr.msk.bf16.mxu1 %vm442_vm0, %v1223_v3  ;;  %v1228_v8 = vld [vmem:[%s1396_s7 + $0x18] sm:$0xff]   ;;  %v1230_v10 = vld [vmem:[%s1396_s7 + $0x20] sm:$0xff]   ;;  %v1232_v12 = vld [vmem:[%s1396_s7 + $0x28] sm:$0xff]  }
  0x34   : > { %1114 = vmatpush3.bf16.msra.mxu0 %v1221_v1  ;;  %1182 = vmatpush3.bf16.msra.mxu1 %v1221_v1  ;;  %v1229_v9 = vld [vmem:[%s1396_s7 + $0x98] sm:$0xff]   ;;  %v1231_v11 = vld [vmem:[%s1396_s7 + $0xa0] sm:$0xff]   ;;  %v1233_v13 = vld [vmem:[%s1396_s7 + $0xa8] sm:$0xff]  }
  0x35   : > { %v1234_v14 = vld [vmem:[%s1396_s7 + $0x30] sm:$0xff]   ;;  %v1236_v16 = vld [vmem:[%s1396_s7 + $0x38] sm:$0xff]   ;;  %v1238_v18 = vld [vmem:[%s1396_s7 + $0x40] sm:$0xff]  }
  0x36   : > { %v1235_v15 = vld [vmem:[%s1396_s7 + $0xb0] sm:$0xff]   ;;  %v1237_v17 = vld [vmem:[%s1396_s7 + $0xb8] sm:$0xff]   ;;  %v1239_v19 = vld [vmem:[%s1396_s7 + $0xc0] sm:$0xff]  }
  0x37   : > { %1116 = vmatmul.mubr.msk.bf16.vlgmr.msra.gmra.mrb[0].mxu0 %vm442_vm0, %v1224_v4  ;;  %1148 = vmatmul.mubr.msk.bf16.vlgmr.msra.gmra.mrb[0].mxu1 %vm442_vm0, %v1225_v5  ;;  %v1240_v20 = vld [vmem:[%s1396_s7 + $0x48] sm:$0xff]   ;;  %v1242_v22 = vld [vmem:[%s1396_s7 + $0x50] sm:$0xff]   ;;  %v1244_v24 = vld [vmem:[%s1396_s7 + $0x58] sm:$0xff]  }
  0x38   : > { %1119 = vmatprep.mubr.msk.bf16.mxu0 %vm442_vm0, %v1226_v6  ;;  %1151 = vmatprep.mubr.msk.bf16.mxu1 %vm442_vm0, %v1227_v7  ;;  %v1241_v21 = vld [vmem:[%s1396_s7 + $0xc8] sm:$0xff]   ;;  %v1243_v23 = vld [vmem:[%s1396_s7 + $0xd0] sm:$0xff]   ;;  %v1245_v25 = vld [vmem:[%s1396_s7 + $0xd8] sm:$0xff]  }
  0x39   : > { %v1246_v26 = vld [vmem:[%s1396_s7 + $0x60] sm:$0xff]   ;;  %v1248_v28 = vld [vmem:[%s1396_s7 + $0x68] sm:$0xff]   ;;  %v1250_v30 = vld [vmem:[%s1396_s7 + $0x70] sm:$0xff]  }
  0x3a   : > { %v1247_v27 = vld [vmem:[%s1396_s7 + $0xe0] sm:$0xff]   ;;  %v1249_v29 = vld [vmem:[%s1396_s7 + $0xe8] sm:$0xff]   ;;  %v1251_v31 = vld [vmem:[%s1396_s7 + $0xf0] sm:$0xff]  }
  0x3b   : > { %v1252_v32 = vld [vmem:[%s1396_s7 + $0x78] sm:$0xff]  }
  0x3c   : > { %v1253_v33 = vld [vmem:[%s1396_s7 + $0xf8] sm:$0xff]  }
  0x3f   : > { %1120 = vmatmul.mubr.msk.bf16.gmra.mrb[4].mxu0 %vm442_vm0, %v1228_v8  ;;  %1152 = vmatmul.mubr.msk.bf16.gmra.mrb[4].mxu1 %vm442_vm0, %v1229_v9 }
  0x40   : > { %1123 = vmatprep.mubr.msk.bf16.mxu0 %vm442_vm0, %v1230_v10  ;;  %1155 = vmatprep.mubr.msk.bf16.mxu1 %vm442_vm0, %v1231_v11 }
  0x47   : > { %1124 = vmatmul.mubr.msk.bf16.gmra.mrb[8].mxu0 %vm442_vm0, %v1232_v12  ;;  %1156 = vmatmul.mubr.msk.bf16.gmra.mrb[8].mxu1 %vm442_vm0, %v1233_v13 }
  0x48   : > { %1127 = vmatprep.mubr.msk.bf16.mxu0 %vm442_vm0, %v1234_v14  ;;  %1159 = vmatprep.mubr.msk.bf16.mxu1 %vm442_vm0, %v1235_v15 }
  0x4f   : > { %1128 = vmatmul.mubr.msk.bf16.gmra.mrb[12].mxu0 %vm442_vm0, %v1236_v16  ;;  %1160 = vmatmul.mubr.msk.bf16.gmra.mrb[12].mxu1 %vm442_vm0, %v1237_v17 }
  0x50   : > { %1131 = vmatprep.mubr.msk.bf16.mxu0 %vm442_vm0, %v1238_v18  ;;  %1163 = vmatprep.mubr.msk.bf16.mxu1 %vm442_vm0, %v1239_v19 }
  0x57   : > { %1132 = vmatmul.mubr.msk.bf16.gmra.mrb[16].mxu0 %vm442_vm0, %v1240_v20  ;;  %1164 = vmatmul.mubr.msk.bf16.gmra.mrb[16].mxu1 %vm442_vm0, %v1241_v21 }
  0x58   : > { %1135 = vmatprep.mubr.msk.bf16.mxu0 %vm442_vm0, %v1242_v22  ;;  %1167 = vmatprep.mubr.msk.bf16.mxu1 %vm442_vm0, %v1243_v23 }
  0x5f   : > { %1136 = vmatmul.mubr.msk.bf16.gmra.mrb[20].mxu0 %vm442_vm0, %v1244_v24  ;;  %1168 = vmatmul.mubr.msk.bf16.gmra.mrb[20].mxu1 %vm442_vm0, %v1245_v25 }
  0x60   : > { %1139 = vmatprep.mubr.msk.bf16.mxu0 %vm442_vm0, %v1246_v26  ;;  %1171 = vmatprep.mubr.msk.bf16.mxu1 %vm442_vm0, %v1247_v27 }
  0x67   : > { %1140 = vmatmul.mubr.msk.bf16.gmra.mrb[24].mxu0 %vm442_vm0, %v1248_v28  ;;  %1172 = vmatmul.mubr.msk.bf16.gmra.mrb[24].mxu1 %vm442_vm0, %v1249_v29 }
  0x68   : > { %1143 = vmatprep.mubr.msk.bf16.mxu0 %vm442_vm0, %v1250_v30  ;;  %1175 = vmatprep.mubr.msk.bf16.mxu1 %vm442_vm0, %v1251_v31 }
  0x6f   : > { %1144 = vmatmul.mubr.msk.bf16.gmra.mrb[28].mxu0 %vm442_vm0, %v1252_v32  ;;  %1176 = vmatmul.mubr.msk.bf16.gmra.mrb[28].mxu1 %vm442_vm0, %v1253_v33 }
 0x10a   : > { %v1117_v34 = vpop.f32.mrb[0].mxu0  ;;  %v1149_v35 = vpop.f32.mrb[0].mxu1 }
 0x10b   : > { %830 = vst.msk [vmem:[%s1466_s16 + $0x10] sm:$0xff] %vm442_vm0, %v1117_v34  ;;  %862 = vst.msk [vmem:[%s1466_s16 + $0x110] sm:$0xff] %vm442_vm0, %v1149_v35  ;;  %v573_v36 = vpop.f32.mrb[1].mxu0  ;;  %v701_v37 = vpop.f32.mrb[1].mxu1 }
 0x10c   : > { %828 = vst.msk [vmem:[%s1466_s16] sm:$0xff] %vm442_vm0, %v573_v36  ;;  %860 = vst.msk [vmem:[%s1466_s16 + $0x100] sm:$0xff] %vm442_vm0, %v701_v37  ;;  %v1118_v38 = vpop.f32.mrb[2].mxu0  ;;  %v1150_v39 = vpop.f32.mrb[2].mxu1 }
 0x10d   : > { %831 = vst.msk [vmem:[%s1466_s16 + $0x18] sm:$0xff] %vm442_vm0, %v1118_v38  ;;  %863 = vst.msk [vmem:[%s1466_s16 + $0x118] sm:$0xff] %vm442_vm0, %v1150_v39  ;;  %v576_v40 = vpop.f32.mrb[3].mxu0  ;;  %v704_v41 = vpop.f32.mrb[3].mxu1 }
 0x10e   : > { %829 = vst.msk [vmem:[%s1466_s16 + $0x8] sm:$0xff] %vm442_vm0, %v576_v40  ;;  %861 = vst.msk [vmem:[%s1466_s16 + $0x108] sm:$0xff] %vm442_vm0, %v704_v41 }
 0x112   : > { %v1121_v42 = vpop.f32.mrb[4].mxu0  ;;  %v1153_v43 = vpop.f32.mrb[4].mxu1 }
 0x113   : > { %834 = vst.msk [vmem:[%s1466_s16 + $0x30] sm:$0xff] %vm442_vm0, %v1121_v42  ;;  %866 = vst.msk [vmem:[%s1466_s16 + $0x130] sm:$0xff] %vm442_vm0, %v1153_v43  ;;  %v589_v44 = vpop.f32.mrb[5].mxu0  ;;  %v717_v45 = vpop.f32.mrb[5].mxu1 }
 0x114   : > { %832 = vst.msk [vmem:[%s1466_s16 + $0x20] sm:$0xff] %vm442_vm0, %v589_v44  ;;  %864 = vst.msk [vmem:[%s1466_s16 + $0x120] sm:$0xff] %vm442_vm0, %v717_v45  ;;  %v1122_v46 = vpop.f32.mrb[6].mxu0  ;;  %v1154_v47 = vpop.f32.mrb[6].mxu1 }
 0x115   : > { %835 = vst.msk [vmem:[%s1466_s16 + $0x38] sm:$0xff] %vm442_vm0, %v1122_v46  ;;  %867 = vst.msk [vmem:[%s1466_s16 + $0x138] sm:$0xff] %vm442_vm0, %v1154_v47  ;;  %v592_v48 = vpop.f32.mrb[7].mxu0  ;;  %v720_v49 = vpop.f32.mrb[7].mxu1 }
 0x116   : > { %833 = vst.msk [vmem:[%s1466_s16 + $0x28] sm:$0xff] %vm442_vm0, %v592_v48  ;;  %865 = vst.msk [vmem:[%s1466_s16 + $0x128] sm:$0xff] %vm442_vm0, %v720_v49 }
 0x11a   : > { %v1125_v50 = vpop.f32.mrb[8].mxu0  ;;  %v1157_v51 = vpop.f32.mrb[8].mxu1 }
 0x11b   : > { %838 = vst.msk [vmem:[%s1466_s16 + $0x50] sm:$0xff] %vm442_vm0, %v1125_v50  ;;  %870 = vst.msk [vmem:[%s1466_s16 + $0x150] sm:$0xff] %vm442_vm0, %v1157_v51  ;;  %v605_v52 = vpop.f32.mrb[9].mxu0  ;;  %v733_v53 = vpop.f32.mrb[9].mxu1 }
 0x11c   : > { %836 = vst.msk [vmem:[%s1466_s16 + $0x40] sm:$0xff] %vm442_vm0, %v605_v52  ;;  %868 = vst.msk [vmem:[%s1466_s16 + $0x140] sm:$0xff] %vm442_vm0, %v733_v53  ;;  %v1126_v54 = vpop.f32.mrb[10].mxu0  ;;  %v1158_v55 = vpop.f32.mrb[10].mxu1 }
 0x11d   : > { %839 = vst.msk [vmem:[%s1466_s16 + $0x58] sm:$0xff] %vm442_vm0, %v1126_v54  ;;  %871 = vst.msk [vmem:[%s1466_s16 + $0x158] sm:$0xff] %vm442_vm0, %v1158_v55  ;;  %v608_v56 = vpop.f32.mrb[11].mxu0  ;;  %v736_v57 = vpop.f32.mrb[11].mxu1 }
 0x11e   : > { %837 = vst.msk [vmem:[%s1466_s16 + $0x48] sm:$0xff] %vm442_vm0, %v608_v56  ;;  %869 = vst.msk [vmem:[%s1466_s16 + $0x148] sm:$0xff] %vm442_vm0, %v736_v57 }
 0x122   : > { %v1129_v58 = vpop.f32.mrb[12].mxu0  ;;  %v1161_v59 = vpop.f32.mrb[12].mxu1 }
 0x123   : > { %842 = vst.msk [vmem:[%s1466_s16 + $0x70] sm:$0xff] %vm442_vm0, %v1129_v58  ;;  %874 = vst.msk [vmem:[%s1466_s16 + $0x170] sm:$0xff] %vm442_vm0, %v1161_v59  ;;  %v621_v60 = vpop.f32.mrb[13].mxu0  ;;  %v749_v61 = vpop.f32.mrb[13].mxu1 }
 0x124   : > { %840 = vst.msk [vmem:[%s1466_s16 + $0x60] sm:$0xff] %vm442_vm0, %v621_v60  ;;  %872 = vst.msk [vmem:[%s1466_s16 + $0x160] sm:$0xff] %vm442_vm0, %v749_v61  ;;  %v1130_v62 = vpop.f32.mrb[14].mxu0  ;;  %v1162_v63 = vpop.f32.mrb[14].mxu1 }
 0x125   : > { %843 = vst.msk [vmem:[%s1466_s16 + $0x78] sm:$0xff] %vm442_vm0, %v1130_v62  ;;  %875 = vst.msk [vmem:[%s1466_s16 + $0x178] sm:$0xff] %vm442_vm0, %v1162_v63  ;;  %v624_v0 = vpop.f32.mrb[15].mxu0  ;;  %v752_v1 = vpop.f32.mrb[15].mxu1 }
 0x126   : > { %841 = vst.msk [vmem:[%s1466_s16 + $0x68] sm:$0xff] %vm442_vm0, %v624_v0  ;;  %873 = vst.msk [vmem:[%s1466_s16 + $0x168] sm:$0xff] %vm442_vm0, %v752_v1 }
 0x12a   : > { %v1133_v2 = vpop.f32.mrb[16].mxu0  ;;  %v1165_v3 = vpop.f32.mrb[16].mxu1 }
 0x12b   : > { %846 = vst.msk [vmem:[%s1466_s16 + $0x90] sm:$0xff] %vm442_vm0, %v1133_v2  ;;  %878 = vst.msk [vmem:[%s1466_s16 + $0x190] sm:$0xff] %vm442_vm0, %v1165_v3  ;;  %v637_v4 = vpop.f32.mrb[17].mxu0  ;;  %v765_v5 = vpop.f32.mrb[17].mxu1 }
 0x12c   : > { %844 = vst.msk [vmem:[%s1466_s16 + $0x80] sm:$0xff] %vm442_vm0, %v637_v4  ;;  %876 = vst.msk [vmem:[%s1466_s16 + $0x180] sm:$0xff] %vm442_vm0, %v765_v5  ;;  %v1134_v6 = vpop.f32.mrb[18].mxu0  ;;  %v1166_v7 = vpop.f32.mrb[18].mxu1 }
 0x12d   : > { %847 = vst.msk [vmem:[%s1466_s16 + $0x98] sm:$0xff] %vm442_vm0, %v1134_v6  ;;  %879 = vst.msk [vmem:[%s1466_s16 + $0x198] sm:$0xff] %vm442_vm0, %v1166_v7  ;;  %v640_v8 = vpop.f32.mrb[19].mxu0  ;;  %v768_v9 = vpop.f32.mrb[19].mxu1 }
 0x12e   : > { %845 = vst.msk [vmem:[%s1466_s16 + $0x88] sm:$0xff] %vm442_vm0, %v640_v8  ;;  %877 = vst.msk [vmem:[%s1466_s16 + $0x188] sm:$0xff] %vm442_vm0, %v768_v9 }
 0x132   : > { %v1137_v10 = vpop.f32.mrb[20].mxu0  ;;  %v1169_v11 = vpop.f32.mrb[20].mxu1 }
 0x133   : > { %850 = vst.msk [vmem:[%s1466_s16 + $0xb0] sm:$0xff] %vm442_vm0, %v1137_v10  ;;  %882 = vst.msk [vmem:[%s1466_s16 + $0x1b0] sm:$0xff] %vm442_vm0, %v1169_v11  ;;  %v653_v12 = vpop.f32.mrb[21].mxu0  ;;  %v781_v13 = vpop.f32.mrb[21].mxu1 }
 0x134   : > { %848 = vst.msk [vmem:[%s1466_s16 + $0xa0] sm:$0xff] %vm442_vm0, %v653_v12  ;;  %880 = vst.msk [vmem:[%s1466_s16 + $0x1a0] sm:$0xff] %vm442_vm0, %v781_v13  ;;  %v1138_v14 = vpop.f32.mrb[22].mxu0  ;;  %v1170_v15 = vpop.f32.mrb[22].mxu1 }
 0x135   : > { %851 = vst.msk [vmem:[%s1466_s16 + $0xb8] sm:$0xff] %vm442_vm0, %v1138_v14  ;;  %883 = vst.msk [vmem:[%s1466_s16 + $0x1b8] sm:$0xff] %vm442_vm0, %v1170_v15  ;;  %v656_v16 = vpop.f32.mrb[23].mxu0  ;;  %v784_v17 = vpop.f32.mrb[23].mxu1 }
 0x136   : > { %849 = vst.msk [vmem:[%s1466_s16 + $0xa8] sm:$0xff] %vm442_vm0, %v656_v16  ;;  %881 = vst.msk [vmem:[%s1466_s16 + $0x1a8] sm:$0xff] %vm442_vm0, %v784_v17 }
 0x13a   : > { %v1141_v18 = vpop.f32.mrb[24].mxu0  ;;  %v1173_v19 = vpop.f32.mrb[24].mxu1 }
 0x13b   : > { %854 = vst.msk [vmem:[%s1466_s16 + $0xd0] sm:$0xff] %vm442_vm0, %v1141_v18  ;;  %886 = vst.msk [vmem:[%s1466_s16 + $0x1d0] sm:$0xff] %vm442_vm0, %v1173_v19  ;;  %v669_v20 = vpop.f32.mrb[25].mxu0  ;;  %v797_v21 = vpop.f32.mrb[25].mxu1 }
 0x13c   : > { %852 = vst.msk [vmem:[%s1466_s16 + $0xc0] sm:$0xff] %vm442_vm0, %v669_v20  ;;  %884 = vst.msk [vmem:[%s1466_s16 + $0x1c0] sm:$0xff] %vm442_vm0, %v797_v21  ;;  %v1142_v22 = vpop.f32.mrb[26].mxu0  ;;  %v1174_v23 = vpop.f32.mrb[26].mxu1 }
 0x13d   : > { %855 = vst.msk [vmem:[%s1466_s16 + $0xd8] sm:$0xff] %vm442_vm0, %v1142_v22  ;;  %887 = vst.msk [vmem:[%s1466_s16 + $0x1d8] sm:$0xff] %vm442_vm0, %v1174_v23  ;;  %v672_v24 = vpop.f32.mrb[27].mxu0  ;;  %v800_v25 = vpop.f32.mrb[27].mxu1 }
 0x13e   : > { %853 = vst.msk [vmem:[%s1466_s16 + $0xc8] sm:$0xff] %vm442_vm0, %v672_v24  ;;  %885 = vst.msk [vmem:[%s1466_s16 + $0x1c8] sm:$0xff] %vm442_vm0, %v800_v25 }
 0x142   : > { %v1145_v26 = vpop.f32.mrb[28].mxu0  ;;  %v1177_v27 = vpop.f32.mrb[28].mxu1 }
 0x143   : > { %858 = vst.msk [vmem:[%s1466_s16 + $0xf0] sm:$0xff] %vm442_vm0, %v1145_v26  ;;  %890 = vst.msk [vmem:[%s1466_s16 + $0x1f0] sm:$0xff] %vm442_vm0, %v1177_v27  ;;  %v685_v28 = vpop.f32.mrb[29].mxu0  ;;  %v813_v29 = vpop.f32.mrb[29].mxu1 }
 0x144   : > { %856 = vst.msk [vmem:[%s1466_s16 + $0xe0] sm:$0xff] %vm442_vm0, %v685_v28  ;;  %888 = vst.msk [vmem:[%s1466_s16 + $0x1e0] sm:$0xff] %vm442_vm0, %v813_v29  ;;  %v1146_v30 = vpop.f32.mrb[30].mxu0  ;;  %v1178_v31 = vpop.f32.mrb[30].mxu1 }
 0x145   : > { %859 = vst.msk [vmem:[%s1466_s16 + $0xf8] sm:$0xff] %vm442_vm0, %v1146_v30  ;;  %891 = vst.msk [vmem:[%s1466_s16 + $0x1f8] sm:$0xff] %vm442_vm0, %v1178_v31  ;;  %v688_v32 = vpop.f32.mrb[31].mxu0  ;;  %v816_v33 = vpop.f32.mrb[31].mxu1 }
 0x146   : > { %857 = vst.msk [vmem:[%s1466_s16 + $0xe8] sm:$0xff] %vm442_vm0, %v688_v32  ;;  %889 = vst.msk [vmem:[%s1466_s16 + $0x1e8] sm:$0xff] %vm442_vm0, %v816_v33 }
 0x147 PF: > { %s13_s11 = sadd.s32 1, %s1308_s11   ;;  %s1616_s9 = smov %s1304_s10 }
 0x148   : > { %p10_p4 = scmp.ge.s32.totalorder %s13_s11, 10   ;;  %s1617_s10 = smov %s1619_s13 }
 0x14a   :  { %12 = sbr.rel (!%p10_p4) target bundleno = 2 (0x2), region = 64 }
 0x151   :  { %922 = vsyncpa [#allocation3], 1 }
 0x152   :  { %924 = vsyncpa [#allocation3 + $0x1], 1 }

</bundles_post_ra>
